<compile_context>
chip_gen: v7x
topology: tpu7x:2x2x1
jax: 0.10.0
libtpu: 0.0.40
codegen_flags: <defaults>
</compile_context>

<pallas_src>
import functools

import jax
import jax.numpy as jnp
from jax import lax
from jax.experimental import pallas as pl
from jax.experimental.pallas import tpu as pltpu

LANE = 128
NEG = -(2.0 ** 100)   # "-inf" mask value, exactly representable in f32 and bf16


def _round_up(a, b):
    return (a + b - 1) // b * b


def _elementwise_dtype():
    # bf16 VPU/EUP exist on v6e/v7x (2x elementwise/exp throughput, half the
    # VMEM traffic on the [tq,tk] temporaries); v5e and older have no bf16
    # VPU/EUP, so keep the softmax pipeline in f32 there.
    try:
        kind = jax.devices()[0].device_kind.lower()
    except Exception:
        return jnp.float32
    return jnp.bfloat16 if ("v6" in kind or "v7" in kind) else jnp.float32


def _att_rows(att):
    """[H, C] per-head attention vector -> [H, H*C] block-diagonal row matrix."""
    H, C = att.shape
    out = jnp.zeros((H, H * C), att.dtype)
    for h in range(H):
        out = out.at[h, h * C:(h + 1) * C].set(att[h])
    return out


# ----------------------------------------------------------------------------
# Kernel A: node projection hp = x @ W (row-tiled, bf16 MXU operands, f32 acc).
# ----------------------------------------------------------------------------
def _gat_project_kernel(x_ref, w_ref, hp_ref, *, compute_dtype):
    hp = jnp.dot(x_ref[...].astype(compute_dtype),
                 w_ref[...].astype(compute_dtype),
                 preferred_element_type=jnp.float32)
    hp_ref[...] = hp.astype(hp_ref.dtype)


# ----------------------------------------------------------------------------
# Kernel B: masked attention with online (flash-style) softmax over source
# tiles + aggregation + bias + ELU.  Output written once, lane-dense, bf16.
# ----------------------------------------------------------------------------
def _gat_attention_kernel(occ_ref, adst_rows_ref, asrc_rows_ref, hpq_ref,
                          hpk_ref, adj_ref, bias_ref, out_ref,
                          adst_sc, m_sc, l_sc, acc_sc,
                          *, heads, c_pad, compute_dtype, elem_dtype):
    H, C = heads, c_pad
    i = pl.program_id(0)
    k = pl.program_id(1)
    n_k = pl.num_programs(1)

    @pl.when(k == 0)
    def _():
        m_sc[...] = jnp.full_like(m_sc, NEG)
        l_sc[...] = jnp.zeros_like(l_sc)
        acc_sc[...] = jnp.zeros_like(acc_sc)
        # destination attention term recomputed here (one tiny MXU matmul per
        # dst tile) instead of round-tripping a lane-narrow [N, H] HBM array.
        adst_sc[...] = lax.dot_general(
            hpq_ref[...], adst_rows_ref[...].astype(compute_dtype),
            (((1,), (1,)), ((), ())), preferred_element_type=jnp.float32)

    # block-sparse skip: empty (dst-tile, src-tile) pairs contribute nothing.
    @pl.when(occ_ref[i * n_k + k] > 0)
    def _():
        elem_zero = jnp.asarray(0.0, elem_dtype)
        elem_neg = jnp.asarray(NEG, elem_dtype)

        # mask handling hoisted out of the per-head loop (one pass per tile).
        mask = adj_ref[...] > 0                                    # [tq, tk]
        maskf = mask.astype(elem_dtype)
        mask_bias = jnp.where(mask, elem_zero, elem_neg)

        # source attention term for this src tile: one small MXU matmul.
        a_srct = lax.dot_general(
            asrc_rows_ref[...].astype(compute_dtype), hpk_ref[...],
            (((1,), (1,)), ((), ())),
            preferred_element_type=jnp.float32).astype(elem_dtype)  # [H, tk]
        a_dst = adst_sc[...].astype(elem_dtype)                     # [tq, H]
        hp_k = hpk_ref[...]                                         # [tk, H*C]

        for h in range(H):                                          # static unroll
            # e[i, j] = LeakyReLU(att_dst . h_i + att_src . h_j), slope 0.2
            base = a_dst[:, h:h + 1] + a_srct[h:h + 1, :]           # [tq, tk]
            logits = jnp.where(base >= 0, base, 0.2 * base) + mask_bias

            m_prev = m_sc[:, h:h + 1]
            m_new = jnp.maximum(
                m_prev,
                jnp.max(logits, axis=1, keepdims=True).astype(jnp.float32))
            # maskf is load-bearing: a fully masked row would otherwise
            # contribute exp(0) = 1 per entry and corrupt l/acc.
            p = jnp.exp(logits - m_new.astype(elem_dtype)) * maskf  # [tq, tk]
            scale = jnp.exp(m_prev - m_new)                         # [tq, 1] f32

            l_sc[:, h:h + 1] = (scale * l_sc[:, h:h + 1]
                                + jnp.sum(p, axis=1, keepdims=True,
                                          dtype=jnp.float32))
            acc_sc[:, h * C:(h + 1) * C] = (
                scale * acc_sc[:, h * C:(h + 1) * C]
                + jnp.dot(p.astype(compute_dtype), hp_k[:, h * C:(h + 1) * C],
                          preferred_element_type=jnp.float32))
            m_sc[:, h:h + 1] = m_new

    @pl.when(k == n_k - 1)
    def _():
        for h in range(H):
            inv_l = pl.reciprocal(l_sc[:, h:h + 1], approx=True)
            seg = acc_sc[:, h * C:(h + 1) * C] * inv_l + bias_ref[h:h + 1, :]
            # ELU; exp only on the clamped negative branch (no inf/NaN hazard).
            acc_sc[:, h * C:(h + 1) * C] = jnp.where(
                seg > 0, seg, jnp.exp(jnp.minimum(seg, 0.0)) - 1.0)
        out_ref[...] = acc_sc[...].astype(out_ref.dtype)   # single lane-dense store


def gat_layer(x_pad, adj_i8, occ_flat, w, att_src, att_dst, bias, *, heads,
              out_per_head, block_q, block_k, compute_dtype=jnp.bfloat16,
              elem_dtype=jnp.float32):
    N_pad, F_in = x_pad.shape
    H, C = heads, out_per_head
    assert N_pad % block_q == 0 and N_pad % block_k == 0

    # Pad the per-head width so the hp store, aggregation matmul and output
    # store are lane-dense (layer 2 has H*C = 32 otherwise).
    C_pad = C if (H * C) % LANE == 0 else _round_up(C, LANE)
    if C_pad != C:
        pc = C_pad - C
        w = jnp.pad(w.reshape(F_in, H, C),
                    ((0, 0), (0, 0), (0, pc))).reshape(F_in, H * C_pad)
        att_src = jnp.pad(att_src, ((0, 0), (0, pc)))
        att_dst = jnp.pad(att_dst, ((0, 0), (0, pc)))
        bias = jnp.pad(bias, ((0, 0), (0, pc)))
    HCp = H * C_pad

    adst_rows = _att_rows(att_dst)                        # [H, H*C_pad]
    asrc_rows = _att_rows(att_src)                        # [H, H*C_pad]

    # ---- Kernel A: projection ------------------------------------------------
    hp = pl.pallas_call(
        functools.partial(_gat_project_kernel, compute_dtype=compute_dtype),
        grid=(N_pad // block_q,),
        in_specs=[pl.BlockSpec((block_q, F_in), lambda i: (i, 0)),
                  pl.BlockSpec((F_in, HCp), lambda i: (0, 0))],
        out_specs=pl.BlockSpec((block_q, HCp), lambda i: (i, 0)),
        out_shape=jax.ShapeDtypeStruct((N_pad, HCp), compute_dtype),
        compiler_params=pltpu.CompilerParams(
            dimension_semantics=("parallel",)),
    )(x_pad, w)

    # ---- Kernel B: flash-style masked attention -------------------------------
    nq, nk = N_pad // block_q, N_pad // block_k
    itm = jnp.dtype(compute_dtype).itemsize
    flops = (2 * N_pad * N_pad * HCp + 10 * N_pad * N_pad * H
             + 2 * nq * N_pad * H * HCp)
    transcendentals = N_pad * N_pad * H + 2 * N_pad * H
    bytes_accessed = (N_pad * N_pad                      # int8 adjacency
                      + nq * N_pad * HCp * itm           # hp re-streamed per dst tile
                      + N_pad * HCp * itm                # hp dst-tile stream
                      + N_pad * HCp * itm                # bf16 output
                      + nq * nk * (2 * H * HCp + H * C_pad) * 4  # att rows + bias
                      + nq * nk * 4)                     # occupancy scalars

    grid_spec = pltpu.PrefetchScalarGridSpec(
        num_scalar_prefetch=1,
        grid=(nq, nk),
        in_specs=[
            pl.BlockSpec((H, HCp), lambda i, k, occ: (0, 0)),           # adst rows
            pl.BlockSpec((H, HCp), lambda i, k, occ: (0, 0)),           # asrc rows
            pl.BlockSpec((block_q, HCp), lambda i, k, occ: (i, 0)),     # hp (dst tile)
            pl.BlockSpec((block_k, HCp), lambda i, k, occ: (k, 0)),     # hp (src tile)
            pl.BlockSpec((block_q, block_k), lambda i, k, occ: (i, k)),  # adjacency
            pl.BlockSpec((H, C_pad), lambda i, k, occ: (0, 0)),         # bias
        ],
        out_specs=pl.BlockSpec((block_q, HCp), lambda i, k, occ: (i, 0)),
        scratch_shapes=[
            pltpu.VMEM((block_q, H), jnp.float32),        # alpha_dst
            pltpu.VMEM((block_q, H), jnp.float32),        # running max
            pltpu.VMEM((block_q, H), jnp.float32),        # running sum
            pltpu.VMEM((block_q, HCp), jnp.float32),      # accumulator
        ])

    out = pl.pallas_call(
        functools.partial(_gat_attention_kernel, heads=H, c_pad=C_pad,
                          compute_dtype=compute_dtype, elem_dtype=elem_dtype),
        grid_spec=grid_spec,
        out_shape=jax.ShapeDtypeStruct((N_pad, HCp), compute_dtype),
        compiler_params=pltpu.CompilerParams(
            dimension_semantics=("parallel", "arbitrary")),
        cost_estimate=pl.CostEstimate(flops=flops,
                                      transcendentals=transcendentals,
                                      bytes_accessed=bytes_accessed),
    )(occ_flat, adst_rows, asrc_rows, hp, hp, adj_i8, bias)

    if C_pad != C:
        out = out.reshape(N_pad, H, C_pad)[:, :, :C].reshape(N_pad, H * C)
    return out


# ----------------------------------------------------------------------------
# Edge MLP kernel: (src*dst, attr) -> Linear -> ReLU -> Linear, tiled over E.
# The concat is realized as a split first-layer weight (emb rows / attr rows).
# ----------------------------------------------------------------------------
def _edge_mlp_kernel(src_ref, dst_ref, attr_ref, w1e_ref, w1a_ref, b1_ref,
                     w2_ref, b2_ref, out_ref, *, compute_dtype):
    emb = (src_ref[...] * dst_ref[...]).astype(compute_dtype)     # [te, hidden]
    h1 = jnp.dot(emb, w1e_ref[...].astype(compute_dtype),
                 preferred_element_type=jnp.float32)
    h1 = h1 + jnp.dot(attr_ref[...].astype(compute_dtype),
                      w1a_ref[...].astype(compute_dtype),
                      preferred_element_type=jnp.float32)
    h1 = jnp.maximum(h1 + b1_ref[...], 0.0)                       # ReLU (f32)
    out_ref[...] = (jnp.dot(h1.astype(compute_dtype),
                            w2_ref[...].astype(compute_dtype),
                            preferred_element_type=jnp.float32)
                    + b2_ref[...]).astype(out_ref.dtype)


def edge_mlp(edge_src, edge_dst, edge_attr, w1e, w1a, b1, w2, b2,
             *, compute_dtype=jnp.bfloat16):
    E, hidden = edge_src.shape
    F_attr = edge_attr.shape[1]
    n_cls = w2.shape[1]
    n_cls_pad = _round_up(n_cls, LANE)              # lane-dense output store
    if n_cls_pad != n_cls:
        w2 = jnp.pad(w2, ((0, 0), (0, n_cls_pad - n_cls)))
        b2 = jnp.pad(b2, ((0, 0), (0, n_cls_pad - n_cls)))

    te = min(1024, _round_up(E, 128))
    E_pad = _round_up(E, te)

    def pad_rows(a):
        return jnp.zeros((E_pad, a.shape[1]), a.dtype).at[:E].set(a)

    src_p, dst_p, attr_p = pad_rows(edge_src), pad_rows(edge_dst), pad_rows(edge_attr)

    out = pl.pallas_call(
        functools.partial(_edge_mlp_kernel, compute_dtype=compute_dtype),
        grid=(E_pad // te,),
        in_specs=[
            pl.BlockSpec((te, hidden), lambda i: (i, 0)),
            pl.BlockSpec((te, hidden), lambda i: (i, 0)),
            pl.BlockSpec((te, F_attr), lambda i: (i, 0)),
            pl.BlockSpec(w1e.shape, lambda i: (0, 0)),
            pl.BlockSpec(w1a.shape, lambda i: (0, 0)),
            pl.BlockSpec(b1.shape, lambda i: (0, 0)),
            pl.BlockSpec(w2.shape, lambda i: (0, 0)),
            pl.BlockSpec(b2.shape, lambda i: (0, 0)),
        ],
        out_specs=pl.BlockSpec((te, n_cls_pad), lambda i: (i, 0)),
        out_shape=jax.ShapeDtypeStruct((E_pad, n_cls_pad), jnp.float32),
        compiler_params=pltpu.CompilerParams(
            dimension_semantics=("parallel",)),
    )(src_p, dst_p, attr_p, w1e, w1a, b1, w2, b2)
    return out[:E, :n_cls]


# ----------------------------------------------------------------------------
# Full EdgePredictor forward (glue in plain JAX, hot paths in Pallas).
# ----------------------------------------------------------------------------
def edge_predictor_forward(params, x, edge_index, edge_attr,
                           edge_label_index, edge_label_attr, *, hidden,
                           block_n=None):
    del edge_attr  # matches the PyTorch forward: edge_attr is never used by GATConv
    N = x.shape[0]
    compute_dtype = jnp.bfloat16
    elem_dtype = _elementwise_dtype()

    if block_n is None:
        # bigger tiles amortize the per-grid-step overhead and cut hp re-streams;
        # 1024 keeps the per-step footprint well inside v5e's 16 MiB scoped VMEM
        # and v7x's 64 MiB physical VMEM while leaving >=2 tiles for megacore
        # sharding at realistic graph sizes.
        block_n = min(1024, _round_up(N, LANE))
    N_pad = _round_up(N, block_n)
    nt = N_pad // block_n

    x_pad = jnp.zeros((N_pad, x.shape[1]), jnp.float32).at[:N].set(x)

    # int8 adjacency with self loops: adj[dst, src] = 1 (diagonal scatter, no
    # full eye/max pass). Self loops also on padded rows keep their softmax
    # denominators positive so no NaNs can leak into real rows via 0 * NaN.
    diag = jnp.arange(N_pad, dtype=jnp.int32)
    adj = jnp.zeros((N_pad, N_pad), jnp.int8)
    adj = adj.at[edge_index[1], edge_index[0]].set(1)
    adj = adj.at[diag, diag].set(1)

    # per-(dst tile, src tile) occupancy for block-sparse tile skipping
    tiles = jnp.arange(nt, dtype=jnp.int32)
    occ = jnp.zeros((nt, nt), jnp.int32)
    occ = occ.at[edge_index[1] // block_n, edge_index[0] // block_n].add(1)
    occ = occ.at[tiles, tiles].add(1)                   # self loops
    occ_flat = occ.reshape(-1)

    x1 = gat_layer(x_pad, adj, occ_flat, params["w1"], params["asrc1"],
                   params["adst1"], params["b1"], heads=4, out_per_head=hidden,
                   block_q=block_n, block_k=block_n,
                   compute_dtype=compute_dtype, elem_dtype=elem_dtype)
    x2 = gat_layer(x1, adj, occ_flat, params["w2"], params["asrc2"],
                   params["adst2"], params["b2"], heads=1, out_per_head=hidden,
                   block_q=block_n, block_k=block_n,
                   compute_dtype=compute_dtype, elem_dtype=elem_dtype)
    x2 = x2[:N]

    # TODO(synk): endpoint row gather kept as XLA glue (bf16 rows halve its
    # traffic); fusing it into the edge MLP kernel would need an in-kernel DMA
    # gather driven by scalar-prefetched edge_label_index (a pl.Element spec
    # would force one grid step per edge row).
    edge_src = jnp.take(x2, edge_label_index[0], axis=0)
    edge_dst = jnp.take(x2, edge_label_index[1], axis=0)

    return edge_mlp(edge_src, edge_dst, edge_label_attr,
                    params["mlp_w1_emb"], params["mlp_w1_attr"], params["mlp_b1"],
                    params["mlp_w2"], params["mlp_b2"],
                    compute_dtype=compute_dtype)


if __name__ == "__main__":
    # small shapes consistent with the module
    F_NODE = 16         # node_feature_dim
    F_EDGE = 8          # edge_feature_dim
    HIDDEN = 32         # hidden_dim
    N_CLS = 3           # num_classes
    HEADS1 = 4

    key = jax.random.PRNGKey(0)
    ks = jax.random.split(key, 20)

    def make_inputs(k_in, n_nodes, n_label):
        kk = jax.random.split(k_in, 4)
        base = jnp.arange(n_nodes, dtype=jnp.int32)
        src = jnp.concatenate([base, base])
        dst = jnp.concatenate([(base + 1) % n_nodes, (base + 3) % n_nodes])
        edge_index = jnp.stack([src, dst])               # duplicate-free, no self loops
        edge_attr = jax.random.normal(kk[0], (edge_index.shape[1], F_EDGE),
                                      jnp.float32)       # unused (as in the module)
        x = jax.random.normal(kk[1], (n_nodes, F_NODE), jnp.float32)
        edge_label_index = jax.random.randint(kk[2], (2, n_label), 0, n_nodes,
                                              jnp.int32)
        # see NOTE at top: hidden + F_edge columns so concat width == 2*hidden + F_edge
        edge_label_attr = jax.random.normal(kk[3], (n_label, HIDDEN + F_EDGE),
                                            jnp.float32)
        return x, edge_index, edge_attr, edge_label_index, edge_label_attr

    def rnd(k, shape):
        return 0.1 * jax.random.normal(k, shape, jnp.float32)

    params = {
        # GAT layer 1: F_NODE -> HIDDEN, heads=4, concat
        "w1": rnd(ks[4], (F_NODE, HEADS1 * HIDDEN)),
        "asrc1": rnd(ks[5], (HEADS1, HIDDEN)),
        "adst1": rnd(ks[6], (HEADS1, HIDDEN)),
        "b1": rnd(ks[7], (HEADS1, HIDDEN)),              # bias [H*C] stored as [H, C]
        # GAT layer 2: 4*HIDDEN -> HIDDEN, heads=1, concat
        "w2": rnd(ks[8], (HEADS1 * HIDDEN, HIDDEN)),
        "asrc2": rnd(ks[9], (1, HIDDEN)),
        "adst2": rnd(ks[10], (1, HIDDEN)),
        "b2": rnd(ks[11], (1, HIDDEN)),
        # edge MLP: Linear(2*HIDDEN + F_EDGE -> 64), ReLU, Linear(64 -> N_CLS)
        "mlp_w1_emb": rnd(ks[12], (HIDDEN, 64)),              # rows multiplying edge_emb
        "mlp_w1_attr": rnd(ks[13], (HIDDEN + F_EDGE, 64)),    # rows multiplying edge_label_attr
        "mlp_b1": rnd(ks[14], (1, 64)),
        "mlp_w2": rnd(ks[15], (64, N_CLS)),
        "mlp_b2": jnp.zeros((1, N_CLS), jnp.float32),
    }

    # 1) small single-tile run
    x, ei, ea, eli, ela = make_inputs(ks[0], 16, 10)
    out = edge_predictor_forward(params, x, ei, ea, eli, ela, hidden=HIDDEN)
    jax.block_until_ready(out)
    assert out.shape == (10, N_CLS)
    assert bool(jnp.all(jnp.isfinite(out)))

    # 2) multi-tile run (3x3 grid with block_n=128) exercising the online-softmax
    #    carry across src tiles and the block-sparse empty-tile skip
    x2, ei2, ea2, eli2, ela2 = make_inputs(ks[1], 300, 64)
    out2 = edge_predictor_forward(params, x2, ei2, ea2, eli2, ela2,
                                  hidden=HIDDEN, block_n=128)
    jax.block_until_ready(out2)
    assert out2.shape == (64, N_CLS)
    assert bool(jnp.all(jnp.isfinite(out2)))

    print("KERNEL_OK")
</pallas_src>

<mosaic_0001>
module attributes {stable_mosaic.version = 11 : i64} {
  func.func @_gat_project_kernel(%arg0: i32, %arg1: memref<128x16xf32, #tpu.memory_space<vmem>>, %arg2: memref<16x128xf32, #tpu.memory_space<vmem>>, %arg3: memref<128x128xbf16, #tpu.memory_space<vmem>>) attributes {dimension_semantics = [#tpu.dimension_semantics<parallel>], iteration_bounds = array<i64: 1>, scalar_prefetch = 0 : i64, scratch_operands = 0 : i64, tpu.core_type = #tpu.core_type<tc>, window_params = [{transform_indices = @transform_0, window_bounds = array<i64: 128, 16>}, {pipeline_mode = #tpu.pipeline_mode<synchronous>, transform_indices = @transform_1, window_bounds = array<i64: 16, 128>}, {transform_indices = @transform_2, window_bounds = array<i64: 128, 128>}]} {
    %c0 = arith.constant 0 : index
    %c0_0 = arith.constant 0 : index
    %0 = vector.load %arg1[%c0, %c0_0] : memref<128x16xf32, #tpu.memory_space<vmem>>, vector<128x16xf32>
    %1 = arith.truncf %0 : vector<128x16xf32> to vector<128x16xbf16>
    %c0_1 = arith.constant 0 : index
    %c0_2 = arith.constant 0 : index
    %2 = vector.load %arg2[%c0_1, %c0_2] : memref<16x128xf32, #tpu.memory_space<vmem>>, vector<16x128xf32>
    %3 = arith.truncf %2 : vector<16x128xf32> to vector<16x128xbf16>
    %cst = arith.constant dense<0.000000e+00> : vector<128x128xf32>
    %4 = tpu.matmul %1, %3, %cst {dimension_numbers = #tpu.dot_dimension_numbers<[1], [0], [0], [1], [0, 0, 1, 1], [], []>} : vector<128x16xbf16>, vector<16x128xbf16>, vector<128x128xf32> -> vector<128x128xf32>
    %5 = arith.truncf %4 : vector<128x128xf32> to vector<128x128xbf16>
    %c0_3 = arith.constant 0 : index
    %c0_4 = arith.constant 0 : index
    %6 = vector.load %arg3[%c0_3, %c0_4] : memref<128x128xbf16, #tpu.memory_space<vmem>>, vector<128x128xbf16>
    tpu.vector_store %arg3[%c0_3, %c0_4], %5 {strides = array<i32>} : memref<128x128xbf16, #tpu.memory_space<vmem>>, vector<128x128xbf16>,
    return
  }
  func.func @transform_0(%arg0: i32) -> (i32, i32) {
    %c0_i32 = arith.constant 0 : i32
    %c0_i32_0 = arith.constant 0 : i32
    return %arg0, %c0_i32 : i32, i32
  }
  func.func @transform_1(%arg0: i32) -> (i32, i32) {
    %c0_i32 = arith.constant 0 : i32
    %c0_i32_0 = arith.constant 0 : i32
    %c0_i32_1 = arith.constant 0 : i32
    return %c0_i32, %c0_i32_0 : i32, i32
  }
  func.func @transform_2(%arg0: i32) -> (i32, i32) {
    %c0_i32 = arith.constant 0 : i32
    %c0_i32_0 = arith.constant 0 : i32
    return %arg0, %c0_i32 : i32, i32
  }
}

</mosaic_0001>

<bundles_post_ra>
// kernel: tpu_custom_call.1
= control target key start
LH: loop header
LB: loop body
LE: loop exit
PB: predicated region body
PF: predicated region fallthrough
CT: control target
= control target key end

     0   :  { %vm40_vm0 = vcmask 130048   ;;  %s493_s0 = inlined_call_operand.vmem [shape: f32[128,16], index: 0, kind: input, shape index: {}]   ;;  %s494_s1 = inlined_call_operand.vmem [shape: f32[16,128], index: 1, kind: input, shape index: {}]   ;;  %s495_s2 = inlined_call_operand.hbm [shape: bf16[128,128], index: 2, kind: output, shape index: {}]  }
   0x1   :  { %v37_v0 = vld [vmem:[%s494_s1] sm:$0xff]  ;;  %v38_v1 = vld [vmem:[%s494_s1 + $0x8] sm:$0xff]  ;;  %v15_v9 = vld [vmem:[%s493_s0 + $0x10] sm:$0xff] }
   0x2   :  { %v13_v2 = vld [vmem:[%s493_s0] sm:$0xff]  ;;  %v39_v3 = vpack.c.bf16 %v38_v1, %v37_v0  ;;  %v14_v4 = vld [vmem:[%s493_s0 + $0x8] sm:$0xff]  ;;  %v16_v10 = vld [vmem:[%s493_s0 + $0x18] sm:$0xff] }
   0x3   :  { %v21_v5 = vld [vmem:[%s493_s0 + $0x40] sm:$0xff]  ;;  %v22_v6 = vld [vmem:[%s493_s0 + $0x48] sm:$0xff]  ;;  %v29_v7 = vpack.c.bf16 %v14_v4, %v13_v2  ;;  %v23_v11 = vld [vmem:[%s493_s0 + $0x50] sm:$0xff]  ;;  %v30_v12 = vpack.c.bf16 %v16_v10, %v15_v9 }
   0x4   :  { %v33_v8 = vpack.c.bf16 %v22_v6, %v21_v5  ;;  %354 = vmatprep.subr.bf16.mxu0 %v39_v3  ;;  %372 = vmatprep.subr.bf16.mxu1 %v39_v3  ;;  %v24_v13 = vld [vmem:[%s493_s0 + $0x58] sm:$0xff]  ;;  %v17_v14 = vld [vmem:[%s493_s0 + $0x20] sm:$0xff]  ;;  %v18_v15 = vld [vmem:[%s493_s0 + $0x28] sm:$0xff] }
   0x5   :  { %355 = vmatpush3.bf16.msra.mxu0 %v39_v3  ;;  %373 = vmatpush3.bf16.msra.mxu1 %v39_v3  ;;  %v34_v16 = vpack.c.bf16 %v24_v13, %v23_v11  ;;  %v31_v17 = vpack.c.bf16 %v18_v15, %v17_v14  ;;  %v25_v18 = vld [vmem:[%s493_s0 + $0x60] sm:$0xff]  ;;  %v26_v19 = vld [vmem:[%s493_s0 + $0x68] sm:$0xff] }
   0x6   :  { %356 = vmatprep.mubr.msk.bf16.mxu0 %vm40_vm0, %v29_v7  ;;  %364 = vmatprep.mubr.msk.bf16.mxu1 %vm40_vm0, %v33_v8  ;;  %v35_v20 = vpack.c.bf16 %v26_v19, %v25_v18 }
   0x7   :  { %7 = vsyncpa [#allocation3], 0  ;;  %v19_v21 = vld [vmem:[%s493_s0 + $0x30] sm:$0xff]  ;;  %v20_v22 = vld [vmem:[%s493_s0 + $0x38] sm:$0xff] }
   0x8   :  { %357 = vmatmul.mubr.msk.bf16.vlgmr.msra.gmra.mrb[0].mxu0 %vm40_vm0, %v30_v12  ;;  %365 = vmatmul.mubr.msk.bf16.vlgmr.msra.gmra.mrb[0].mxu1 %vm40_vm0, %v34_v16  ;;  %v27_v23 = vld [vmem:[%s493_s0 + $0x70] sm:$0xff]  ;;  %v28_v24 = vld [vmem:[%s493_s0 + $0x78] sm:$0xff]  ;;  %v32_v25 = vpack.c.bf16 %v20_v22, %v19_v21  ;;  %s401_s0 = smov [#allocation2]  }
   0x9   :  { %360 = vmatprep.mubr.msk.bf16.mxu0 %vm40_vm0, %v31_v17  ;;  %368 = vmatprep.mubr.msk.bf16.mxu1 %vm40_vm0, %v35_v20  ;;  %v36_v26 = vpack.c.bf16 %v28_v24, %v27_v23  ;;  %s247_s16 = sshll.u32 %s401_s0, 4  ;;  %s248_s16 = int_to_ptr.vmem [resolvable:$true] %s247_s16 }
   0xa   :  { %s377_s17 = scalar_lea.vmem %s248_s16, 1024  ;;  %p382_p1 = scmp.lt.s32.totalorder %s248_s16, %s248_s16 }
   0xb   :  { %p378_p0 = scmp.ne.s32.totalorder %s248_s16, %s377_s17  ;;  %p383_p2 = scmp.lt.s32.totalorder %s377_s17, %s377_s17 }
   0xd   :  { %p384_p3 = por %p383_p2, %p382_p1 }
   0xf   :  { %p385_p4 = pnand %p384_p3, %p378_p0 }
  0x10   :  { %361 = vmatmul.mubr.msk.bf16.gmra.mrb[4].mxu0 %vm40_vm0, %v32_v25  ;;  %369 = vmatmul.mubr.msk.bf16.gmra.mrb[4].mxu1 %vm40_vm0, %v36_v26 }
  0xdb   :  { %v358_v27 = vpop.f32.mrb[0].mxu0  ;;  %v366_v28 = vpop.f32.mrb[0].mxu1 }
  0xdc   :  { %v99_v29 = vpop.f32.mrb[1].mxu0  ;;  %v131_v30 = vpop.f32.mrb[1].mxu1 }
  0xdd   :  { %v359_v31 = vpop.f32.mrb[2].mxu0  ;;  %v367_v32 = vpop.f32.mrb[2].mxu1 }
  0xde   :  { %v306_v33 = vpack.c.bf16 %v359_v31, %v358_v27  ;;  %v326_v34 = vpack.c.bf16 %v367_v32, %v366_v28  ;;  %v102_v35 = vpop.f32.mrb[3].mxu0  ;;  %v134_v36 = vpop.f32.mrb[3].mxu1 }
  0xdf   :  { %v301_v37 = vpack.c.bf16 %v102_v35, %v99_v29  ;;  %v321_v38 = vpack.c.bf16 %v134_v36, %v131_v30 }
  0xe0   :  { %338 = vst [vmem:[#allocation2 + $0x8] sm:$0xff] %v306_v33   ;;  %342 = vst [vmem:[#allocation2 + $0x28] sm:$0xff] %v326_v34  }
  0xe1   :  { %302 = vst [vmem:[#allocation2] sm:$0xff] %v301_v37   ;;  %341 = vst [vmem:[#allocation2 + $0x20] sm:$0xff] %v321_v38  }
  0xe3   :  { %v362_v39 = vpop.f32.mrb[4].mxu0  ;;  %v370_v40 = vpop.f32.mrb[4].mxu1 }
  0xe4   :  { %v115_v41 = vpop.f32.mrb[5].mxu0  ;;  %v147_v42 = vpop.f32.mrb[5].mxu1 }
  0xe5   :  { %v363_v43 = vpop.f32.mrb[6].mxu0  ;;  %v371_v44 = vpop.f32.mrb[6].mxu1 }
  0xe6   :  { %v316_v45 = vpack.c.bf16 %v363_v43, %v362_v39  ;;  %v336_v46 = vpack.c.bf16 %v371_v44, %v370_v40  ;;  %v118_v47 = vpop.f32.mrb[7].mxu0  ;;  %v150_v48 = vpop.f32.mrb[7].mxu1 }
  0xe7   :  { %v311_v49 = vpack.c.bf16 %v118_v47, %v115_v41  ;;  %v331_v50 = vpack.c.bf16 %v150_v48, %v147_v42 }
  0xe8   :  { %340 = vst [vmem:[#allocation2 + $0x18] sm:$0xff] %v316_v45   ;;  %344 = vst [vmem:[#allocation2 + $0x38] sm:$0xff] %v336_v46  }
  0xe9   :  { %339 = vst [vmem:[#allocation2 + $0x10] sm:$0xff] %v311_v49   ;;  %343 = vst [vmem:[#allocation2 + $0x30] sm:$0xff] %v331_v50  }
  0xea   :  { %388 = shalt.err (!%p385_p4)
}
  0xeb   :  { %s389_s20 = scalar_lea.hbm %s495_s2, 1024 }
  0xec   :  { %p390_p5 = scmp.ne.s32.totalorder %s495_s2, %s389_s20  ;;  %p393_p6 = scmp.lt.u32.totalorder %s389_s20, %s495_s2 }
  0xee   :  { %p395_p7 = pnand %p393_p6, %p390_p5 }
  0xf0   :  { %398 = shalt.err (!%p395_p7)
}
  0xf1   :  { %s402_s24 = smov 64   ;;  %s403_s25 = smov 4  }
  0xf2   :  { %253 = dma.vmem_to_hbm [thread:$0]  %s248_s16, 1024, %s495_s2, [#allocation3], %s402_s24, %s402_s24, %s403_s25  }
  0xf3   :  { %399 = dma.done.wait [#allocation3], 1024  }
  0xf4   :  { %400 = vsyncadd [#allocation3], 4294966272 }
  0xf5   :  { %257 = vsyncpa [#allocation3], 1 }

</bundles_post_ra>
